<compile_context>
chip_gen: v5e
topology: v5e:2x2
jax: 0.10.0
libtpu: 0.0.40
codegen_flags: <defaults>
</compile_context>

<pallas_src>
import math
from functools import partial

import numpy as np
import jax
import jax.numpy as jnp
from jax import lax
from jax.experimental import pallas as pl
from jax.experimental.pallas import tpu as pltpu

SHIFT = 0
REDUCE = 1


def _round_up(x, m):
    return ((x + m - 1) // m) * m


# ----------------------------------------------------------------------------
# Kernel 1: fused, row-tiled buffer projection
#   gc  = x @ [Wg | Wc] + [bg | bc]        (one MXU call, lane width 2H)
#   h   = sigmoid(gc[:, :H]) * tanh(gc[:, H:])
#   out = [h | c]                          (single lane-dense output slab)
# ----------------------------------------------------------------------------
def _buffer_proj_kernel(x_ref, w_ref, b_ref, out_ref, *, hidden):
    x = x_ref[...]
    gc = jnp.dot(x, w_ref[...], preferred_element_type=jnp.float32) + b_ref[...]
    g = gc[:, :hidden]
    c = gc[:, hidden:]
    h = jax.nn.sigmoid(g) * jnp.tanh(c)
    out_ref[...] = jnp.concatenate([h, c], axis=-1)


def buffer_projection(x2d, w_gc, b_gc, hidden, tile_rows=256):
    """x2d: (N, E) -> (N_pad, 2H) slab [h | c]; rows >= N are padding."""
    n, e = x2d.shape
    tm = min(tile_rows, _round_up(n, 8))
    n_pad = _round_up(n, tm)
    if n_pad != n:
        x2d = jnp.pad(x2d, ((0, n_pad - n), (0, 0)))
    return pl.pallas_call(
        partial(_buffer_proj_kernel, hidden=hidden),
        out_shape=jax.ShapeDtypeStruct((n_pad, 2 * hidden), jnp.float32),
        grid=(n_pad // tm,),
        in_specs=[
            pl.BlockSpec((tm, e), lambda i: (i, 0)),
            pl.BlockSpec((e, 2 * hidden), lambda i: (0, 0)),   # weights stay resident
            pl.BlockSpec((1, 2 * hidden), lambda i: (0, 0)),
        ],
        out_specs=pl.BlockSpec((tm, 2 * hidden), lambda i: (i, 0)),
        compiler_params=pltpu.CompilerParams(dimension_semantics=("parallel",)),
    )(x2d, w_gc, b_gc)


# ----------------------------------------------------------------------------
# Kernel 2: whole shift-reduce schedule in one gridded kernel.
#   grid axis = reduce step (sequential / "arbitrary").
#   SMEM (scalar prefetch): per-step left/right child (group, row) indices and
#   per-sentence root (group, row) indices.
#   VMEM scratch: node store (groups, bk_pad, 2H), persists across grid steps.
# ----------------------------------------------------------------------------
def _tree_reduce_kernel(lg_ref, lr_ref, rg_ref, rr_ref, og_ref, or_ref,   # SMEM prefetch
                        leaf_ref, w_igo_ref, b_igo_ref, wf_ref, bf_ref,   # VMEM inputs
                        out_ref,                                          # VMEM output
                        nodes_ref,                                        # VMEM scratch
                        *, hidden, bk_pad, b_pad, n_leaf_groups, num_steps):
    H = hidden
    step = pl.program_id(0)

    # Step 0: materialize the leaf nodes in the node store, clear the output.
    @pl.when(step == 0)
    def _init():
        nodes_ref[0:n_leaf_groups] = leaf_ref[...]
        out_ref[...] = jnp.zeros_like(out_ref)

    # Hoisted sublane-id plane shared by every one-hot row select.
    row_ids = lax.broadcasted_iota(jnp.int32, (bk_pad, 2 * H), 0)

    def pick_row(g, r):
        # Dynamic index only on the leading (group) axis; the row is selected
        # with a one-hot mask + sublane reduce (no dynamic sublane access).
        grp = nodes_ref[g]                                       # (bk_pad, 2H)
        return jnp.sum(jnp.where(row_ids == r, grp, 0.0), axis=0, keepdims=True)

    def gather(g_ref, r_ref, base, count):
        rows = [pick_row(g_ref[base + k], r_ref[base + k]) for k in range(count)]
        return jnp.concatenate(rows, axis=0)                     # (count, 2H)

    # Padded slots gather node (0, 0) and produce results that are never read
    # back, so no masking is needed.
    base = step * bk_pad
    child_l = gather(lg_ref, lr_ref, base, bk_pad)
    child_r = gather(rg_ref, rr_ref, base, bk_pad)

    hl, cl = child_l[:, :H], child_l[:, H:]
    hr, cr = child_r[:, :H], child_r[:, H:]
    child_sum = hl + hr

    # Fused i/g/o gates: one (bk_pad, H) x (H, 3H) MXU call.
    igo = (jnp.dot(child_sum, w_igo_ref[...], preferred_element_type=jnp.float32)
           + b_igo_ref[...])
    i = jax.nn.sigmoid(igo[:, :H])
    g = jnp.tanh(igo[:, H:2 * H])
    o = jax.nn.sigmoid(igo[:, 2 * H:])

    # Forget gates for both children with a single stacked (2*bk_pad, H) matmul.
    f = (jnp.dot(jnp.concatenate([hl, hr], axis=0), wf_ref[...],
                 preferred_element_type=jnp.float32) + bf_ref[...])
    f = jax.nn.sigmoid(f)
    f_l, f_r = f[:bk_pad], f[bk_pad:]

    c = i * g + f_l * cl + f_r * cr
    h = o * jnp.tanh(c)

    # This step's new nodes fill exactly one store group (dynamic leading idx).
    nodes_ref[n_leaf_groups + step] = jnp.concatenate([h, c], axis=-1)

    # Last step: gather the per-sentence root states into the output slab.
    @pl.when(step == num_steps - 1)
    def _final():
        roots = [pick_row(og_ref[b], or_ref[b]) for b in range(b_pad)]
        out_ref[...] = jnp.concatenate(roots, axis=0)


def tree_reduce(leaf3d, w_igo, b_igo, wf, bf,
                lg, lr, rg, rr, root_g, root_r,
                *, hidden, bk_pad, b_pad, num_steps):
    n_leaf_groups = leaf3d.shape[0]
    n_groups = n_leaf_groups + num_steps
    H = hidden
    kernel = partial(_tree_reduce_kernel, hidden=H, bk_pad=bk_pad, b_pad=b_pad,
                     n_leaf_groups=n_leaf_groups, num_steps=num_steps)
    # TODO(synk): for very large B*T / deep trees the node store should live in
    # HBM (memory_space=pl.ANY) with manual make_async_copy gathers instead of
    # a single VMEM scratch.
    return pl.pallas_call(
        kernel,
        out_shape=jax.ShapeDtypeStruct((b_pad, 2 * H), jnp.float32),
        grid_spec=pltpu.PrefetchScalarGridSpec(
            num_scalar_prefetch=6,
            grid=(num_steps,),
            in_specs=[
                pl.BlockSpec((n_leaf_groups, bk_pad, 2 * H), lambda s, *_: (0, 0, 0)),
                pl.BlockSpec((H, 3 * H), lambda s, *_: (0, 0)),   # resident weights
                pl.BlockSpec((1, 3 * H), lambda s, *_: (0, 0)),
                pl.BlockSpec((H, H), lambda s, *_: (0, 0)),
                pl.BlockSpec((1, H), lambda s, *_: (0, 0)),
            ],
            out_specs=pl.BlockSpec((b_pad, 2 * H), lambda s, *_: (0, 0)),
            scratch_shapes=[pltpu.VMEM((n_groups, bk_pad, 2 * H), jnp.float32)],
        ),
        compiler_params=pltpu.CompilerParams(dimension_semantics=("arbitrary",)),
    )(lg, lr, rg, rr, root_g, root_r, leaf3d, w_igo, b_igo, wf, bf)


# ----------------------------------------------------------------------------
# Host-side schedule construction (mirrors the reference stack machine, but on
# integer node indices only).  Nodes are addressed as (group, row) pairs into
# the (groups, bk_pad, 2H) node store.
# ----------------------------------------------------------------------------
def build_schedule(transitions, B, T, bk_pad, b_pad, n_leaf_groups):
    transitions = np.asarray(transitions)
    buffers = [[b * T + t for t in range(T)] for b in range(B)]   # pop() from end
    stacks = [[] for _ in range(B)]
    lg, lr, rg, rr = [], [], [], []
    num_steps = 0
    for t_batch in transitions:
        red_l, red_r, red_b = [], [], []
        for b, tr in enumerate(t_batch):
            if tr == SHIFT:
                stacks[b].append(buffers[b].pop())
            elif tr == REDUCE:
                assert len(stacks[b]) >= 2, 'Stack too small!'
                red_r.append(stacks[b].pop())
                red_l.append(stacks[b].pop())
                red_b.append(b)
        if red_l:
            lg_row = [0] * bk_pad
            lr_row = [0] * bk_pad
            rg_row = [0] * bk_pad
            rr_row = [0] * bk_pad
            for k, (l, r, b) in enumerate(zip(red_l, red_r, red_b)):
                lg_row[k], lr_row[k] = divmod(l, bk_pad)
                rg_row[k], rr_row[k] = divmod(r, bk_pad)
                stacks[b].append((n_leaf_groups + num_steps) * bk_pad + k)
            lg.extend(lg_row); lr.extend(lr_row)
            rg.extend(rg_row); rr.extend(rr_row)
            num_steps += 1
    root_g = [0] * b_pad
    root_r = [0] * b_pad
    for b in range(B):
        assert len(stacks[b]) >= 1, 'Empty stack at end of transitions!'
        root_g[b], root_r[b] = divmod(stacks[b][-1], bk_pad)
    return (np.asarray(lg, np.int32), np.asarray(lr, np.int32),
            np.asarray(rg, np.int32), np.asarray(rr, np.int32),
            np.asarray(root_g, np.int32), np.asarray(root_r, np.int32), num_steps)


def init_params(key, input_size, hidden_size):
    k = jax.random.split(key, 12)
    stdv_cell = 1.0 / math.sqrt(hidden_size)   # ChildSumCell.reset_parameters
    stdv_proj = 1.0 / math.sqrt(input_size)    # nn.Linear default init
    u = lambda kk, shape, s: jax.random.uniform(kk, shape, jnp.float32, -s, s)
    return {
        'proj_x_w': u(k[0], (input_size, hidden_size), stdv_proj),
        'proj_x_b': u(k[1], (1, hidden_size), stdv_proj),
        'proj_x_gate_w': u(k[2], (input_size, hidden_size), stdv_proj),
        'proj_x_gate_b': u(k[3], (1, hidden_size), stdv_proj),
        'wi': u(k[4], (hidden_size, hidden_size), stdv_cell),
        'wg': u(k[5], (hidden_size, hidden_size), stdv_cell),
        'wo': u(k[6], (hidden_size, hidden_size), stdv_cell),
        'bi': u(k[7], (1, hidden_size), stdv_cell),
        'bg': u(k[8], (1, hidden_size), stdv_cell),
        'bo': u(k[9], (1, hidden_size), stdv_cell),
        'wf': u(k[10], (hidden_size, hidden_size), stdv_cell),
        'bf': u(k[11], (1, hidden_size), stdv_cell),
    }


def child_sum_lstm_forward(x, transitions, params):
    """
    x: [B, T, E] float32 word embeddings (assumed reversed, as in the reference)
    transitions: [2T-1, B] host-side int array of SHIFT/REDUCE ops
    returns: [B, H] root hidden states
    """
    B, T, E = x.shape
    H = params['proj_x_w'].shape[1]

    # One-time weight fusion (lane-dense MXU operands).
    w_gc = jnp.concatenate([params['proj_x_gate_w'], params['proj_x_w']], axis=1)  # (E, 2H)
    b_gc = jnp.concatenate([params['proj_x_gate_b'], params['proj_x_b']], axis=1)  # (1, 2H)
    w_igo = jnp.concatenate([params['wi'], params['wg'], params['wo']], axis=1)    # (H, 3H)
    b_igo = jnp.concatenate([params['bi'], params['bg'], params['bo']], axis=1)    # (1, 3H)

    # Hot path 1: all leaf projections in one tiled, pipelined kernel.
    leaf_slab = buffer_projection(x.reshape(B * T, E), w_gc, b_gc, H)  # (N_pad, 2H)

    bk_pad = _round_up(B, 8)   # reduce slots per step, padded for full sublanes
    b_pad = _round_up(B, 8)
    n_leaf_pad = _round_up(B * T, bk_pad)
    if leaf_slab.shape[0] < n_leaf_pad:
        leaf_slab = jnp.pad(leaf_slab, ((0, n_leaf_pad - leaf_slab.shape[0]), (0, 0)))
    else:
        leaf_slab = leaf_slab[:n_leaf_pad]
    n_leaf_groups = n_leaf_pad // bk_pad

    (lg, lr, rg, rr, root_g, root_r, num_steps) = build_schedule(
        transitions, B, T, bk_pad, b_pad, n_leaf_groups)

    if num_steps == 0:
        # Degenerate case (no REDUCE at all): roots are leaves.
        flat_roots = root_g[:B] * bk_pad + root_r[:B]
        return jnp.take(leaf_slab, jnp.asarray(flat_roots), axis=0)[:, :H]

    leaf3d = leaf_slab.reshape(n_leaf_groups, bk_pad, 2 * H)

    # Hot path 2: the entire reduce schedule in ONE gridded kernel.
    out = tree_reduce(leaf3d, w_igo, b_igo, params['wf'], params['bf'],
                      jnp.asarray(lg), jnp.asarray(lr),
                      jnp.asarray(rg), jnp.asarray(rr),
                      jnp.asarray(root_g), jnp.asarray(root_r),
                      hidden=H, bk_pad=bk_pad, b_pad=b_pad, num_steps=num_steps)
    return out[:B, :H]


# ----------------------------------------------------------------------------
# Pure NumPy reference (mirrors the PyTorch module) for a correctness check.
# ----------------------------------------------------------------------------
def _reference_forward_np(x, transitions, params):
    x = np.asarray(x, np.float32)
    p = {k: np.asarray(v, np.float32) for k, v in params.items()}
    B, T, _ = x.shape
    H = p['proj_x_w'].shape[1]
    sig = lambda v: 1.0 / (1.0 + np.exp(-v))
    c_buf = x @ p['proj_x_w'] + p['proj_x_b']
    h_buf = sig(x @ p['proj_x_gate_w'] + p['proj_x_gate_b']) * np.tanh(c_buf)
    buffers = [[np.concatenate([h_buf[b, t], c_buf[b, t]])[None, :] for t in range(T)]
               for b in range(B)]
    stacks = [[] for _ in range(B)]
    for t_batch in np.asarray(transitions):
        child_l, child_r, idxs = [], [], []
        for b, tr in enumerate(t_batch):
            if tr == SHIFT:
                stacks[b].append(buffers[b].pop())
            elif tr == REDUCE:
                child_r.append(stacks[b].pop()); child_l.append(stacks[b].pop()); idxs.append(b)
        if child_l:
            L = np.concatenate(child_l, 0); R = np.concatenate(child_r, 0)
            hl, cl = L[:, :H], L[:, H:]; hr, cr = R[:, :H], R[:, H:]
            cs = hl + hr
            i = sig(cs @ p['wi'] + p['bi'])
            g = np.tanh(cs @ p['wg'] + p['bg'])
            o = sig(cs @ p['wo'] + p['bo'])
            fl = sig(hl @ p['wf'] + p['bf'])
            fr = sig(hr @ p['wf'] + p['bf'])
            c = i * g + fl * cl + fr * cr
            h = o * np.tanh(c)
            new = np.concatenate([h, c], axis=-1)
            for k, b in enumerate(idxs):
                stacks[b].append(new[k:k + 1])
    return np.concatenate([st.pop()[:, :H] for st in stacks], 0)


if __name__ == "__main__":
    B, T, E, H = 2, 8, 16, 32

    key = jax.random.PRNGKey(0)
    kx, kp = jax.random.split(key)
    x = jax.random.normal(kx, (B, T, E), dtype=jnp.float32)
    params = init_params(kp, E, H)

    # Valid transition sequence (same binary tree for every example):
    # T shifts and T-1 reduces, length 2T-1.
    seq = [SHIFT, SHIFT]
    for _ in range(T - 1):
        seq += [REDUCE, SHIFT]
    seq = seq[:2 * T - 1]
    transitions = np.tile(np.asarray(seq, dtype=np.int32)[:, None], (1, B))  # [2T-1, B]

    out = child_sum_lstm_forward(x, transitions, params)
    out = jax.block_until_ready(out)
    assert out.shape == (B, H)

    ref = _reference_forward_np(x, transitions, params)
    assert np.max(np.abs(np.asarray(out) - ref)) < 1e-3, "mismatch vs reference"

    print("KERNEL_OK")
</pallas_src>

<mosaic_0001>
module attributes {stable_mosaic.version = 11 : i64} {
  func.func @_buffer_proj_kernel(%arg0: i32, %arg1: memref<16x16xf32, #tpu.memory_space<vmem>>, %arg2: memref<16x64xf32, #tpu.memory_space<vmem>>, %arg3: memref<1x64xf32, #tpu.memory_space<vmem>>, %arg4: memref<16x64xf32, #tpu.memory_space<vmem>>) attributes {dimension_semantics = [#tpu.dimension_semantics<parallel>], iteration_bounds = array<i64: 1>, scalar_prefetch = 0 : i64, scratch_operands = 0 : i64, tpu.core_type = #tpu.core_type<tc>, window_params = [{transform_indices = @transform_0, window_bounds = array<i64: 16, 16>}, {pipeline_mode = #tpu.pipeline_mode<synchronous>, transform_indices = @transform_1, window_bounds = array<i64: 16, 64>}, {pipeline_mode = #tpu.pipeline_mode<synchronous>, transform_indices = @transform_2, window_bounds = array<i64: 1, 64>}, {transform_indices = @transform_3, window_bounds = array<i64: 16, 64>}]} {
    %c0 = arith.constant 0 : index
    %c0_0 = arith.constant 0 : index
    %0 = vector.load %arg1[%c0, %c0_0] : memref<16x16xf32, #tpu.memory_space<vmem>>, vector<16x16xf32>
    %c0_1 = arith.constant 0 : index
    %c0_2 = arith.constant 0 : index
    %1 = vector.load %arg2[%c0_1, %c0_2] : memref<16x64xf32, #tpu.memory_space<vmem>>, vector<16x64xf32>
    %cst = arith.constant dense<0.000000e+00> : vector<16x64xf32>
    %2 = tpu.matmul %0, %1, %cst {dimension_numbers = #tpu.dot_dimension_numbers<[1], [0], [0], [1], [0, 0, 1, 1], [], []>} : vector<16x16xf32>, vector<16x64xf32>, vector<16x64xf32> -> vector<16x64xf32>
    %c0_3 = arith.constant 0 : index
    %c0_4 = arith.constant 0 : index
    %3 = vector.load %arg3[%c0_3, %c0_4] : memref<1x64xf32, #tpu.memory_space<vmem>>, vector<1x64xf32>
    %4 = vector.broadcast %3 : vector<1x64xf32> to vector<16x64xf32>
    %5 = arith.addf %2, %4 : vector<16x64xf32>
    %6 = vector.extract_strided_slice %5 {offsets = [0, 0], sizes = [16, 32], strides = [1, 1]} : vector<16x64xf32> to vector<16x32xf32>
    %7 = vector.extract_strided_slice %5 {offsets = [0, 32], sizes = [16, 32], strides = [1, 1]} : vector<16x64xf32> to vector<16x32xf32>
    %8 = arith.negf %6 : vector<16x32xf32>
    %9 = math.exp %8 : vector<16x32xf32>
    %cst_5 = arith.constant 1.000000e+00 : f32
    %10 = vector.broadcast %cst_5 : f32 to vector<16x32xf32>
    %11 = arith.addf %10, %9 : vector<16x32xf32>
    %12 = arith.divf %10, %11 : vector<16x32xf32>
    %13 = math.tanh %7 : vector<16x32xf32>
    %14 = arith.mulf %12, %13 : vector<16x32xf32>
    %15 = tpu.concatenate %14, %7 in 1 : vector<16x32xf32>, vector<16x32xf32> -> vector<16x64xf32>
    %c0_6 = arith.constant 0 : index
    %c0_7 = arith.constant 0 : index
    %16 = vector.load %arg4[%c0_6, %c0_7] : memref<16x64xf32, #tpu.memory_space<vmem>>, vector<16x64xf32>
    tpu.vector_store %arg4[%c0_6, %c0_7], %15 {strides = array<i32>} : memref<16x64xf32, #tpu.memory_space<vmem>>, vector<16x64xf32>,
    return
  }
  func.func @transform_0(%arg0: i32) -> (i32, i32) {
    %c0_i32 = arith.constant 0 : i32
    %c0_i32_0 = arith.constant 0 : i32
    return %arg0, %c0_i32 : i32, i32
  }
  func.func @transform_1(%arg0: i32) -> (i32, i32) {
    %c0_i32 = arith.constant 0 : i32
    %c0_i32_0 = arith.constant 0 : i32
    %c0_i32_1 = arith.constant 0 : i32
    return %c0_i32, %c0_i32_0 : i32, i32
  }
  func.func @transform_2(%arg0: i32) -> (i32, i32) {
    %c0_i32 = arith.constant 0 : i32
    %c0_i32_0 = arith.constant 0 : i32
    %c0_i32_1 = arith.constant 0 : i32
    return %c0_i32, %c0_i32_0 : i32, i32
  }
  func.func @transform_3(%arg0: i32) -> (i32, i32) {
    %c0_i32 = arith.constant 0 : i32
    %c0_i32_0 = arith.constant 0 : i32
    return %arg0, %c0_i32 : i32, i32
  }
}

</mosaic_0001>

<bundles_post_ra>
// kernel: tpu_custom_call.1
= control target key start
LH: loop header
LB: loop body
LE: loop exit
PB: predicated region body
PF: predicated region fallthrough
CT: control target
= control target key end

     0   :  { %8 = vsyncpa [#allocation3], 0  ;;  %s315_s0 = inlined_call_operand.hbm [shape: f32[16,16], index: 0, kind: input, shape index: {}]   ;;  %s316_s1 = inlined_call_operand.hbm [shape: f32[16,64], index: 1, kind: input, shape index: {}]   ;;  %s317_s2 = inlined_call_operand.vmem [shape: f32[1,64], index: 2, kind: input, shape index: {}]   ;;  %s318_s3 = inlined_call_operand.hbm [shape: f32[16,64], index: 3, kind: output, shape index: {}]  }
   0x1   :  { %9 = vsyncpa [#allocation6], 0 }
   0x2   :  { %10 = vsyncpa [#allocation4], 0  ;;  %s15_s14 = sshll.u32 %s315_s0, 4  ;;  %s264_s15 = smov [#allocation2]   ;;  %s16_s14 = int_to_ptr.hbm [resolvable:$true] %s15_s14 }
   0x3   :  { %s17_s16 = sshll.u32 %s264_s15, 4  ;;  %s28_s19 = sshll.u32 %s316_s1, 4  ;;  %s18_s16 = int_to_ptr.vmem [resolvable:$true] %s17_s16  ;;  %s29_s19 = int_to_ptr.hbm [resolvable:$true] %s28_s19 }
   0x4   :  { %s265_s20 = smov 128   ;;  %s266_s21 = smov 8  }
   0x5   :  { %23 = dma.hbm_to_vmem [thread:$0]  %s16_s14, 256, %s18_s16, [#allocation3], %s265_s20, %s265_s20, %s266_s21  }
   0x6   :  { %s267_s22 = smov [#allocation5]  }
   0x7   :  { %s30_s23 = sshll.u32 %s267_s22, 4  ;;  %s31_s23 = int_to_ptr.vmem [resolvable:$true] %s30_s23 }
   0x8   :  { %36 = dma.hbm_to_vmem [thread:$0]  %s29_s19, 256, %s31_s23, [#allocation6], %s265_s20, %s265_s20, %s266_s21  }
   0x9   :  { %258 = dma.done.wait [#allocation3], 256  }
   0xa   :  { %259 = vsyncadd [#allocation3], 4294967040 }
   0xb   :  { %260 = dma.done.wait [#allocation6], 256  }
   0xc   :  { %261 = vsyncadd [#allocation6], 4294967040  ;;  %v50_v0 = vld [vmem:[#allocation5 + $0x8] sm:$0xff]  ;;  %v49_v1 = vld [vmem:[#allocation5] sm:$0xff]  ;;  %vm55_vm0 = vcmask 130048   ;;  %s268_s24 = smov 96  }
   0xd   :  { %76 = vmatpush.msra.mxu0 %v50_v0  ;;  %165 = vmatpush.msra.mxu1 %v50_v0  ;;  %v47_v2 = vld [vmem:[#allocation2] sm:$0xff]  ;;  %v48_v3 = vld [vmem:[#allocation2 + $0x8] sm:$0xff]  ;;  %vm135_vm5 = vcmask 261120   ;;  %vm138_vm8 = vcmask 523264   ;;  %s147_s28 = sshll.u32 %s318_s3, 4  ;;  %s148_s28 = int_to_ptr.hbm [resolvable:$true] %s147_s28 }
   0xe   :  { %v173_v4 = vld [vmem:[%s317_s2] ss:$0 sm:$0xff]  ;;  %s269_s2 = smov [#allocation7]  }
   0xf   :  { %77 = vmatpush.msra.mxu0 %v49_v1  ;;  %166 = vmatpush.msra.mxu1 %v49_v1  ;;  %s145_s25 = sshll.u32 %s269_s2, 4  ;;  %s146_s25 = int_to_ptr.vmem [resolvable:$true] %s145_s25 }
  0x10   :  { %161 = vmatmul.msk.f32.vlgmr.msra.gmra.mxu0 %vm55_vm0, %v47_v2  ;;  %162 = vmatmul.msk.f32.vlgmr.msra.gmra.mxu1 %vm55_vm0, %v48_v3 }
  0x8d   :  { %v79_v5 = vpop.f32.mrf.mxu0  ;;  %v82_v7 = vpop.f32.mrf.mxu1 }
  0x8e   :  { %v80_v6 = vadd.f32 %v173_v4, %v79_v5  ;;  %v83_v8 = vadd.f32 %v173_v4, %v82_v7 }
  0x90   :  { %174 = vtanh.f32 %v80_v6  ;;  %v163_v11 = vmul.f32 -1.442695, %v80_v6  ;;  %v164_v12 = vmul.f32 -1.442695, %v83_v8 }
  0x91   :  { %176 = vtanh.f32 %v83_v8 }
  0x92   :  { %178 = vpow2.f32 %v163_v11 }
  0x93   :  { %180 = vpow2.f32 %v164_v12 }
  0x96   :  { %v175_v9 = vpop.eup %174 }
  0x97   :  { %127 = vrot.lane.b32.xlu0 %v175_v9, %s268_s24  ;;  %v177_v10 = vpop.eup %176 }
  0x98   :  { %v179_v13 = vpop.eup %178 }
  0x99   :  { %v91_v14 = vadd.f32 1.0, %v179_v13  ;;  %v181_v15 = vpop.eup %180 }
  0x9a   :  { %v92_v16 = vadd.f32 1.0, %v181_v15 }
  0x9b   :  { %182 = vrcp.f32 %v91_v14  ;;  %v104_v25 = vand.u32 2147483648, %v91_v14  ;;  %vm98_vm2 = vweird.f32 %v91_v14  ;;  %v102_v26 = vand.u32 2147483647, %v91_v14 }
  0x9c   :  { %184 = vrcp.f32 %v92_v16  ;;  %vm113_vm6 = vweird.f32 %v92_v16  ;;  %v119_v34 = vand.u32 2147483648, %v92_v16  ;;  %v117_v36 = vand.u32 2147483647, %v92_v16 }
  0x9d   :  { %v105_v29 = vor.u32 1.1754944e-38, %v104_v25  ;;  %vm103_vm4 = vcmp.eq.f32.partialorder %v102_v26, 8.507059e+37 }
  0x9e   :  { %v120_v38 = vor.u32 1.1754944e-38, %v119_v34  ;;  %vm118_vm10 = vcmp.eq.f32.partialorder %v117_v36, 8.507059e+37 }
  0x9f   :  { %129 = vrot.lane.b32.xlu0 %v177_v10, %s268_s24 }
  0xa1   :  { %v183_v17 = vpop.eup %182 }
  0xa2   :  { %v94_v18 = vmul.f32 %v183_v17, %v91_v14  ;;  %v185_v20 = vpop.eup %184  ;;  %vm99_vm1 = vweird.f32 %v183_v17 }
  0xa3   :  { %v109_v22 = vmul.f32 %v185_v20, %v92_v16  ;;  %vm100_vm3 = vmor %vm98_vm2, %vm99_vm1  ;;  %vm114_vm7 = vweird.f32 %v185_v20 }
  0xa4   :  { %v95_v19 = vsub.f32 1.0, %v94_v18  ;;  %vm115_vm9 = vmor %vm113_vm6, %vm114_vm7 }
  0xa5   :  { %v110_v24 = vsub.f32 1.0, %v109_v22 }
  0xa6   :  { %v96_v21 = vmul.f32 %v183_v17, %v95_v19 }
  0xa7   :  { %v111_v28 = vmul.f32 %v185_v20, %v110_v24 }
  0xa8   :  { %v97_v23 = vadd.f32 %v183_v17, %v96_v21 }
  0xa9   :  { %v112_v33 = vadd.f32 %v185_v20, %v111_v28 }
  0xaa   :  { %v101_v27 = vsel %vm100_vm3, %v183_v17, %v97_v23 }
  0xab   :  { %v106_v31 = vsel %vm103_vm4, %v105_v29, %v101_v27  ;;  %v116_v37 = vsel %vm115_vm9, %v185_v20, %v112_v33 }
  0xac   :  { %v121_v39 = vsel %vm118_vm10, %v120_v38, %v116_v37 }
 0x109   :  { %v128_v30 = vpop.permute.xlu0 %127 }
 0x10a   :  { %v133_v32 = vmul.f32 %v128_v30, %v106_v31 }
 0x10c   :  { %v136_v35 = vsel %vm135_vm5, %v133_v32, %v80_v6 }
 0x10d   :  { %139 = vst.msk [vmem:[#allocation7] sm:$0xff] %vm138_vm8, %v136_v35 }
 0x111   :  { %v130_v40 = vpop.permute.xlu0 %129 }
 0x112   :  { %v134_v41 = vmul.f32 %v130_v40, %v121_v39 }
 0x114   :  { %v137_v42 = vsel %vm135_vm5, %v134_v41, %v83_v8 }
 0x115   :  { %140 = vst.msk [vmem:[#allocation7 + $0x8] sm:$0xff] %vm138_vm8, %v137_v42 }
 0x116   :  { %153 = dma.vmem_to_hbm [thread:$0]  %s146_s25, 256, %s148_s28, [#allocation4], %s265_s20, %s265_s20, %s266_s21  }
 0x117   :  { %262 = dma.done.wait [#allocation4], 256  }
 0x118   :  { %263 = vsyncadd [#allocation4], 4294967040 }
 0x119   :  { %158 = vsyncpa [#allocation3], 1 }
 0x11a   :  { %159 = vsyncpa [#allocation6], 1 }
 0x11b   :  { %160 = vsyncpa [#allocation4], 1 }

</bundles_post_ra>
